<compile_context>
chip_gen: v5e
topology: v5e:2x2
jax: 0.10.0
libtpu: 0.0.40
codegen_flags: <defaults>
</compile_context>

<pallas_src>
import functools

import jax
import jax.numpy as jnp
from jax.experimental import pallas as pl
from jax.experimental.pallas import tpu as pltpu


# ----------------------------------------------------------------------------
# Kernel
# ----------------------------------------------------------------------------
def utterance_encoder_kernel(h_ref, w_ref, b_ref, o_ref, acc_ref, *,
                             seq_len, seq_tile):
    """h_ref:   [TB, TS, E]   encoder hidden states (one batch/seq tile)
       w_ref:   [E, O_pad]    bf16 output-layer weight (zero-padded columns)
       b_ref:   [1, O_pad]    f32 bias (zero-padded)
       o_ref:   [TB, O_pad]   f32 ReLU(mean_pool(h) @ W + b)
       acc_ref: [TB, E]       f32 running sum over the sequence axis"""
    s = pl.program_id(1)
    n_s = pl.num_programs(1)

    @pl.when(s == 0)
    def _init():
        acc_ref[...] = jnp.zeros_like(acc_ref)

    if seq_len % seq_tile != 0:
        # Ragged sequence: only the last tile pays for the mask.
        @pl.when(s != n_s - 1)
        def _body():
            acc_ref[...] += jnp.sum(h_ref[...], axis=1, dtype=jnp.float32)

        @pl.when(s == n_s - 1)
        def _body_masked():
            h = h_ref[...]
            start = s * seq_tile
            idx = jax.lax.broadcasted_iota(jnp.int32, (1, seq_tile, 1), 1)
            h = jnp.where((start + idx) < seq_len, h, jnp.zeros_like(h))
            acc_ref[...] += jnp.sum(h, axis=1, dtype=jnp.float32)
    else:
        # Steady state: plain streamed sum, accumulated in f32 (no f32 temp tile).
        acc_ref[...] += jnp.sum(h_ref[...], axis=1, dtype=jnp.float32)

    @pl.when(s == n_s - 1)
    def _finalize():
        # Mean = sum * 1/S applied on the f32 accumulator, then bf16 for the MXU.
        pooled = (acc_ref[...] * (1.0 / seq_len)).astype(jnp.bfloat16)  # [TB, E]
        y = jnp.dot(pooled, w_ref[...],
                    preferred_element_type=jnp.float32)                 # [TB, O_pad]
        y = y + b_ref[...]
        o_ref[...] = jnp.maximum(y, 0.0).astype(o_ref.dtype)


# ----------------------------------------------------------------------------
# One-time parameter preparation (hoisted out of the per-call wrapper)
# ----------------------------------------------------------------------------
def prepare_output_layer_params(out_w, out_b):
    """out_w: [E, O] (= torch Linear weight.T), out_b: [O].
       Returns W padded to a lane-dense [E, O_pad] bf16 and bias [1, O_pad] f32."""
    E, O = out_w.shape
    o_pad = ((O + 127) // 128) * 128
    w_pad = jnp.zeros((E, o_pad), jnp.bfloat16).at[:, :O].set(
        out_w.astype(jnp.bfloat16))
    b_pad = jnp.zeros((1, o_pad), jnp.float32).at[0, :O].set(
        out_b.astype(jnp.float32))
    return w_pad, b_pad


# ----------------------------------------------------------------------------
# Tile selection (HBM-bound kernel: biggest h tile that double-buffers in VMEM)
# ----------------------------------------------------------------------------
def _round_down_mult(n, m):
    return (n // m) * m


def _select_tiles(B, S, E, h_itemsize, vmem_budget_bytes):
    # Batch tile: sublane-aligned (multiple of 8) or the full batch.  Keep >= 2
    # batch blocks when B permits so the "parallel" axis shards across both
    # v7x TensorCores; cap at 128 (MXU row tile).
    if B <= 8:
        tb = B
    else:
        tb = min(128, max(8, _round_down_mult(pl.cdiv(B, 2), 8)))
        tb = min(tb, _round_down_mult(B, 8)) if B >= 8 else B

    # Sequence tile: grow until the per-buffer h block uses ~half the budget
    # (double-buffered input = ~full budget), leaving headroom for acc/W/out.
    per_seq_row_bytes = max(1, tb * E * h_itemsize)
    h_budget_per_buffer = max(8 * per_seq_row_bytes, vmem_budget_bytes // 4)
    ts_cap = h_budget_per_buffer // per_seq_row_bytes
    if S <= ts_cap:
        ts = S                                   # whole sequence in one tile
    else:
        ts = max(8, min(512, _round_down_mult(ts_cap, 8)))
    return tb, ts


# ----------------------------------------------------------------------------
# Forward wrapper
# ----------------------------------------------------------------------------
def utterance_encoder_forward(last_hidden_states, w_pad, b_pad, *,
                              output_size=None,
                              batch_tile=None, seq_tile=None,
                              vmem_budget_bytes=48 << 20):
    """last_hidden_states: [B, S, E] (stand-in for BERT/encoder output; any
       float dtype — no wrapper-side cast, so no extra HBM pass).
       w_pad/b_pad: from prepare_output_layer_params().
       Returns [B, output_size] f32 = ReLU(mean_pool(h) @ W + b)."""
    B, S, E = last_hidden_states.shape
    E2, O_pad = w_pad.shape
    assert E == E2
    O = O_pad if output_size is None else output_size

    h_itemsize = jnp.dtype(last_hidden_states.dtype).itemsize
    tb, ts = _select_tiles(B, S, E, h_itemsize, vmem_budget_bytes)
    if batch_tile is not None:
        tb = min(batch_tile, B)
        if tb != B:
            tb = max(8, _round_down_mult(tb, 8))
    if seq_tile is not None:
        ts = min(seq_tile, S)
        if ts != S:
            ts = max(8, _round_down_mult(ts, 8))

    # Explicit scoped-VMEM limit (defaults: 16 MiB v5e / 32 MiB v6e-v7x would
    # reject the big tiles); capped at 64 MiB so it is valid on v7x too.
    vmem_need = (2 * tb * ts * E * h_itemsize        # double-buffered h
                 + tb * E * 4                        # f32 accumulator
                 + 2 * E * O_pad * 2                 # resident W (bf16)
                 + 2 * O_pad * 4                     # bias
                 + 2 * tb * O_pad * 4)               # output block
    vmem_limit = int(min(max(vmem_need * 3 // 2, 32 << 20), 64 << 20))

    grid = (pl.cdiv(B, tb), pl.cdiv(S, ts))
    kernel = functools.partial(utterance_encoder_kernel, seq_len=S, seq_tile=ts)

    out = pl.pallas_call(
        kernel,
        out_shape=jax.ShapeDtypeStruct((B, O_pad), jnp.float32),
        grid_spec=pltpu.PrefetchScalarGridSpec(
            num_scalar_prefetch=0,
            grid=grid,
            in_specs=[
                # h: tiled over (batch, seq); E stays whole on the lane axis.
                pl.BlockSpec((tb, ts, E), lambda b, s: (b, s, 0)),
                # W / bias: constant block index -> DMA'd once, resident.
                pl.BlockSpec((E, O_pad), lambda b, s: (0, 0)),
                pl.BlockSpec((1, O_pad), lambda b, s: (0, 0)),
            ],
            # Same output block across the seq axis -> accumulator semantics.
            out_specs=pl.BlockSpec((tb, O_pad), lambda b, s: (b, 0)),
            scratch_shapes=[pltpu.VMEM((tb, E), jnp.float32)],
        ),
        compiler_params=pltpu.CompilerParams(
            dimension_semantics=("parallel", "arbitrary"),
            vmem_limit_bytes=vmem_limit),
    )(last_hidden_states, w_pad, b_pad)

    return out[:, :O] if O != O_pad else out


# ----------------------------------------------------------------------------
# Self-test
# ----------------------------------------------------------------------------
if __name__ == "__main__":
    # Small shapes consistent with the module's forward:
    #   batch=8 utterances, seq=32 tokens, encoder_output_size=128, output=64.
    B, S, E, O = 8, 32, 128, 64

    key = jax.random.PRNGKey(0)
    k_h, k_w, k_b = jax.random.split(key, 3)

    # TODO(synk): BertTokenizer / pretrained BertModel / the injected `encoder`
    # module have no clean Pallas equivalent; we synthesize their output
    # (`last_hidden_states`) deterministically instead of loading checkpoints.
    last_hidden_states = jax.random.normal(k_h, (B, S, E), dtype=jnp.float32)

    # Deterministic init of nn.Linear(encoder_output_size, 64) params
    # (uniform(-1/sqrt(fan_in), 1/sqrt(fan_in)), like PyTorch's default).
    bound = 1.0 / (E ** 0.5)
    out_w = jax.random.uniform(k_w, (E, O), jnp.float32, -bound, bound)  # weight.T
    out_b = jax.random.uniform(k_b, (O,), jnp.float32, -bound, bound)

    # One-time parameter prep (padding to lane-dense 128 cols + bf16 cast).
    w_pad, b_pad = prepare_output_layer_params(out_w, out_b)

    out = utterance_encoder_forward(last_hidden_states, w_pad, b_pad,
                                    output_size=O)
    out = jax.block_until_ready(out)

    # Reference in plain JAX, mirroring the kernel's quantization points
    # (f32 mean-pool -> bf16, W -> bf16, MXU f32 accumulate).
    pooled = jnp.mean(last_hidden_states, axis=1)
    pooled_q = pooled.astype(jnp.bfloat16).astype(jnp.float32)
    w_q = out_w.astype(jnp.bfloat16).astype(jnp.float32)
    ref = jnp.maximum(pooled_q @ w_q + out_b, 0.0)

    assert out.shape == (B, O)
    assert jnp.allclose(out, ref, atol=1e-2, rtol=1e-2), (
        float(jnp.max(jnp.abs(out - ref))))

    print("KERNEL_OK")
</pallas_src>

<mosaic_0001>
module attributes {stable_mosaic.version = 11 : i64} {
  func.func @utterance_encoder_kernel(%arg0: i32, %arg1: i32, %arg2: memref<8x32x128xf32, #tpu.memory_space<vmem>>, %arg3: memref<128x128xbf16, #tpu.memory_space<vmem>>, %arg4: memref<1x128xf32, #tpu.memory_space<vmem>>, %arg5: memref<8x128xf32, #tpu.memory_space<vmem>>, %arg6: memref<8x128xf32, #tpu.memory_space<vmem>>) attributes {dimension_semantics = [#tpu.dimension_semantics<parallel>, #tpu.dimension_semantics<arbitrary>], iteration_bounds = array<i64: 1, 1>, scalar_prefetch = 0 : i64, scratch_operands = 1 : i64, tpu.core_type = #tpu.core_type<tc>, window_params = [{transform_indices = @transform_0, window_bounds = array<i64: 8, 32, 128>}, {pipeline_mode = #tpu.pipeline_mode<synchronous>, transform_indices = @transform_1, window_bounds = array<i64: 128, 128>}, {pipeline_mode = #tpu.pipeline_mode<synchronous>, transform_indices = @transform_2, window_bounds = array<i64: 1, 128>}, {transform_indices = @transform_3, window_bounds = array<i64: 8, 128>}]} {
    %c0_i32 = arith.constant 0 : i32
    %0 = arith.cmpi eq, %arg1, %c0_i32 : i32
    %1 = arith.extui %0 : i1 to i32
    %c0_i32_0 = arith.constant 0 : i32
    %2 = arith.cmpi ne, %1, %c0_i32_0 : i32
    scf.if %2 {
      %cst_9 = arith.constant 0.000000e+00 : f32
      %11 = vector.broadcast %cst_9 : f32 to vector<8x128xf32>
      %c0_10 = arith.constant 0 : index
      %c0_11 = arith.constant 0 : index
      %12 = vector.load %arg6[%c0_10, %c0_11] : memref<8x128xf32, #tpu.memory_space<vmem>>, vector<8x128xf32>
      tpu.vector_store %arg6[%c0_10, %c0_11], %11 {strides = array<i32>} : memref<8x128xf32, #tpu.memory_space<vmem>>, vector<8x128xf32>,
    } else {
    }
    %c0 = arith.constant 0 : index
    %c0_1 = arith.constant 0 : index
    %3 = vector.load %arg6[%c0, %c0_1] : memref<8x128xf32, #tpu.memory_space<vmem>>, vector<8x128xf32>
    %c0_2 = arith.constant 0 : index
    %c0_3 = arith.constant 0 : index
    %c0_4 = arith.constant 0 : index
    %4 = vector.load %arg2[%c0_2, %c0_3, %c0_4] : memref<8x32x128xf32, #tpu.memory_space<vmem>>, vector<8x32x128xf32>
    %cst = arith.constant dense<0.000000e+00> : vector<8x128xf32>
    %5 = vector.multi_reduction <add>, %4, %cst [1] : vector<8x32x128xf32> to vector<8x128xf32>
    %6 = arith.addf %3, %5 : vector<8x128xf32>
    %c0_5 = arith.constant 0 : index
    %c0_6 = arith.constant 0 : index
    %7 = vector.load %arg6[%c0_5, %c0_6] : memref<8x128xf32, #tpu.memory_space<vmem>>, vector<8x128xf32>
    tpu.vector_store %arg6[%c0_5, %c0_6], %6 {strides = array<i32>} : memref<8x128xf32, #tpu.memory_space<vmem>>, vector<8x128xf32>,
    %c0_i32_7 = arith.constant 0 : i32
    %8 = arith.cmpi eq, %arg1, %c0_i32_7 : i32
    %9 = arith.extui %8 : i1 to i32
    %c0_i32_8 = arith.constant 0 : i32
    %10 = arith.cmpi ne, %9, %c0_i32_8 : i32
    scf.if %10 {
      %c0_9 = arith.constant 0 : index
      %c0_10 = arith.constant 0 : index
      %11 = vector.load %arg6[%c0_9, %c0_10] : memref<8x128xf32, #tpu.memory_space<vmem>>, vector<8x128xf32>
      %cst_11 = arith.constant 3.125000e-02 : f32
      %12 = vector.broadcast %cst_11 : f32 to vector<8x128xf32>
      %13 = arith.mulf %11, %12 : vector<8x128xf32>
      %14 = arith.truncf %13 : vector<8x128xf32> to vector<8x128xbf16>
      %c0_12 = arith.constant 0 : index
      %c0_13 = arith.constant 0 : index
      %15 = vector.load %arg3[%c0_12, %c0_13] : memref<128x128xbf16, #tpu.memory_space<vmem>>, vector<128x128xbf16>
      %cst_14 = arith.constant dense<0.000000e+00> : vector<8x128xf32>
      %16 = tpu.matmul %14, %15, %cst_14 {dimension_numbers = #tpu.dot_dimension_numbers<[1], [0], [0], [1], [0, 0, 1, 1], [], []>} : vector<8x128xbf16>, vector<128x128xbf16>, vector<8x128xf32> -> vector<8x128xf32>
      %c0_15 = arith.constant 0 : index
      %c0_16 = arith.constant 0 : index
      %17 = vector.load %arg4[%c0_15, %c0_16] : memref<1x128xf32, #tpu.memory_space<vmem>>, vector<1x128xf32>
      %18 = vector.broadcast %17 : vector<1x128xf32> to vector<8x128xf32>
      %19 = arith.addf %16, %18 : vector<8x128xf32>
      %cst_17 = arith.constant 0.000000e+00 : f32
      %20 = vector.broadcast %cst_17 : f32 to vector<8x128xf32>
      %21 = arith.maximumf %19, %20 : vector<8x128xf32>
      %c0_18 = arith.constant 0 : index
      %c0_19 = arith.constant 0 : index
      %22 = vector.load %arg5[%c0_18, %c0_19] : memref<8x128xf32, #tpu.memory_space<vmem>>, vector<8x128xf32>
      tpu.vector_store %arg5[%c0_18, %c0_19], %21 {strides = array<i32>} : memref<8x128xf32, #tpu.memory_space<vmem>>, vector<8x128xf32>,
    } else {
    }
    return
  }
  func.func @transform_0(%arg0: i32, %arg1: i32) -> (i32, i32, i32) {
    %c0_i32 = arith.constant 0 : i32
    %c0_i32_0 = arith.constant 0 : i32
    return %arg0, %arg1, %c0_i32 : i32, i32, i32
  }
  func.func @transform_1(%arg0: i32, %arg1: i32) -> (i32, i32) {
    %c0_i32 = arith.constant 0 : i32
    %c0_i32_0 = arith.constant 0 : i32
    %c0_i32_1 = arith.constant 0 : i32
    return %c0_i32, %c0_i32_0 : i32, i32
  }
  func.func @transform_2(%arg0: i32, %arg1: i32) -> (i32, i32) {
    %c0_i32 = arith.constant 0 : i32
    %c0_i32_0 = arith.constant 0 : i32
    %c0_i32_1 = arith.constant 0 : i32
    return %c0_i32, %c0_i32_0 : i32, i32
  }
  func.func @transform_3(%arg0: i32, %arg1: i32) -> (i32, i32) {
    %c0_i32 = arith.constant 0 : i32
    %c0_i32_0 = arith.constant 0 : i32
    return %arg0, %c0_i32 : i32, i32
  }
}

</mosaic_0001>

<bundles_post_ra>
// kernel: tpu_custom_call.1
= control target key start
LH: loop header
LB: loop body
LE: loop exit
PB: predicated region body
PF: predicated region fallthrough
CT: control target
= control target key end

     0   :  { %8 = vsyncpa [#allocation4], 0  ;;  %s457_s0 = inlined_call_operand.hbm [shape: f32[8,32,128], index: 0, kind: input, shape index: {}]   ;;  %s458_s1 = inlined_call_operand.hbm [shape: bf16[128,128], index: 1, kind: input, shape index: {}]   ;;  %s459_s2 = inlined_call_operand.vmem [shape: f32[1,128], index: 2, kind: input, shape index: {}]   ;;  %s460_s3 = inlined_call_operand.hbm [shape: f32[8,128], index: 3, kind: output, shape index: {}]  }
   0x1   :  { %9 = vsyncpa [#allocation7], 0 }
   0x2   :  { %10 = vsyncpa [#allocation5], 0  ;;  %s15_s14 = sshll.u32 %s457_s0, 4  ;;  %s415_s15 = smov [#allocation3]   ;;  %s16_s14 = int_to_ptr.hbm [resolvable:$true] %s15_s14 }
   0x3   :  { %s17_s16 = sshll.u32 %s415_s15, 4  ;;  %s28_s19 = sshll.u32 %s458_s1, 4  ;;  %s18_s16 = int_to_ptr.vmem [resolvable:$true] %s17_s16  ;;  %s29_s19 = int_to_ptr.hbm [resolvable:$true] %s28_s19 }
   0x4   :  { %s416_s20 = smov 128   ;;  %s417_s21 = smov 8  }
   0x5   :  { %23 = dma.hbm_to_vmem [thread:$0]  %s16_s14, 4096, %s18_s16, [#allocation4], %s416_s20, %s416_s20, %s417_s21  }
   0x6   :  { %s418_s22 = smov [#allocation6]   ;;  %s419_s24 = smov 64  }
   0x7   :  { %s30_s23 = sshll.u32 %s418_s22, 4  ;;  %s420_s25 = smov 4   ;;  %s31_s23 = int_to_ptr.vmem [resolvable:$true] %s30_s23 }
   0x8   :  { %36 = dma.hbm_to_vmem [thread:$0]  %s29_s19, 1024, %s31_s23, [#allocation7], %s419_s24, %s419_s24, %s420_s25  }
   0x9   :  { %409 = dma.done.wait [#allocation4], 4096  }
   0xa   :  { %410 = vsyncadd [#allocation4], 4294963200 }
   0xb   :  { %411 = dma.done.wait [#allocation7], 1024  }
   0xc   :  { %412 = vsyncadd [#allocation7], 4294966272  ;;  %v328_v0 = vld [vmem:[#allocation6 + $0x38] sm:$0xff]  ;;  %v327_v1 = vld [vmem:[#allocation6 + $0x30] sm:$0xff]  ;;  %vm165_vm0 = vcmask 1041409   ;;  %vm167_vm1 = vcmask 1042434  }
   0xd   :  { %256 = vmatpush.bf16.msra.mxu0 %v328_v0  ;;  %v53_v2 = vld [vmem:[#allocation3] sm:$0xff]  ;;  %v54_v3 = vld [vmem:[#allocation3 + $0x8] sm:$0xff]  ;;  %v55_v4 = vld [vmem:[#allocation3 + $0x10] sm:$0xff]  ;;  %vm169_vm2 = vcmask 1043459   ;;  %vm171_vm3 = vcmask 1044484   ;;  %vm173_vm4 = vcmask 1045509  }
   0xe   :  { %v326_v5 = vld [vmem:[#allocation6 + $0x28] sm:$0xff]  ;;  %v57_v6 = vld [vmem:[#allocation3 + $0x20] sm:$0xff]  ;;  %v59_v8 = vld [vmem:[#allocation3 + $0x30] sm:$0xff]  ;;  %v85_v9 = vadd.f32 %v54_v3, %v53_v2  ;;  %vm175_vm5 = vcmask 1046534   ;;  %vm177_vm6 = vcmask 1047559   ;;  %s421_s26 = smov [#allocation8]  }
   0xf   :  { %v58_v7 = vld [vmem:[#allocation3 + $0x28] sm:$0xff]  ;;  %v56_v10 = vld [vmem:[#allocation3 + $0x18] sm:$0xff]  ;;  %v61_v11 = vld [vmem:[#allocation3 + $0x40] sm:$0xff]  ;;  %s276_s27 = sshll.u32 %s421_s26, 4  ;;  %s278_s30 = sshll.u32 %s460_s3, 4  ;;  %s277_s27 = int_to_ptr.vmem [resolvable:$true] %s276_s27  ;;  %s279_s30 = int_to_ptr.hbm [resolvable:$true] %s278_s30 }
  0x10   :  { %v62_v12 = vld [vmem:[#allocation3 + $0x48] sm:$0xff]  ;;  %v94_v13 = vadd.f32 %v58_v7, %v57_v6  ;;  %v60_v14 = vld [vmem:[#allocation3 + $0x38] sm:$0xff]  ;;  %v63_v15 = vld [vmem:[#allocation3 + $0x50] sm:$0xff]  ;;  %v86_v17 = vadd.f32 %v85_v9, %v55_v4 }
  0x11   :  { %257 = vmatpush.bf16.msra.mxu0 %v327_v1  ;;  %v65_v16 = vld [vmem:[#allocation3 + $0x60] sm:$0xff]  ;;  %v103_v18 = vadd.f32 %v62_v12, %v61_v11  ;;  %v64_v19 = vld [vmem:[#allocation3 + $0x58] sm:$0xff]  ;;  %v66_v20 = vld [vmem:[#allocation3 + $0x68] sm:$0xff] }
  0x12   :  { %v67_v21 = vld [vmem:[#allocation3 + $0x70] sm:$0xff]  ;;  %v95_v22 = vadd.f32 %v94_v13, %v59_v8  ;;  %v325_v23 = vld [vmem:[#allocation6 + $0x20] sm:$0xff]  ;;  %v70_v25 = vld [vmem:[#allocation3 + $0x88] sm:$0xff]  ;;  %v87_v27 = vadd.f32 %v86_v17, %v56_v10  ;;  %v112_v29 = vadd.f32 %v66_v20, %v65_v16 }
  0x13   :  { %v69_v24 = vld [vmem:[#allocation3 + $0x80] sm:$0xff]  ;;  %v71_v26 = vld [vmem:[#allocation3 + $0x90] sm:$0xff]  ;;  %v104_v28 = vadd.f32 %v103_v18, %v63_v15  ;;  %v68_v30 = vld [vmem:[#allocation3 + $0x78] sm:$0xff] }
  0x14   :  { %v73_v31 = vld [vmem:[#allocation3 + $0xa0] sm:$0xff]  ;;  %v74_v32 = vld [vmem:[#allocation3 + $0xa8] sm:$0xff]  ;;  %v96_v33 = vadd.f32 %v95_v22, %v60_v14  ;;  %v121_v34 = vadd.f32 %v70_v25, %v69_v24  ;;  %v72_v35 = vld [vmem:[#allocation3 + $0x98] sm:$0xff]  ;;  %v88_v38 = vrot.slane %v87_v27, 4  ;;  %v113_v40 = vadd.f32 %v112_v29, %v67_v21 }
  0x15   :  { %258 = vmatpush.bf16.msra.mxu0 %v326_v5  ;;  %v75_v36 = vld [vmem:[#allocation3 + $0xb0] sm:$0xff]  ;;  %v77_v37 = vld [vmem:[#allocation3 + $0xc0] sm:$0xff]  ;;  %v105_v39 = vadd.f32 %v104_v28, %v64_v19  ;;  %v130_v41 = vadd.f32 %v74_v32, %v73_v31  ;;  %v76_v42 = vld [vmem:[#allocation3 + $0xb8] sm:$0xff] }
  0x16   :  { %v78_v43 = vld [vmem:[#allocation3 + $0xc8] sm:$0xff]  ;;  %v79_v44 = vld [vmem:[#allocation3 + $0xd0] sm:$0xff]  ;;  %v97_v45 = vrot.slane %v96_v33, 4  ;;  %v122_v46 = vadd.f32 %v121_v34, %v71_v26  ;;  %v81_v47 = vld [vmem:[#allocation3 + $0xe0] sm:$0xff]  ;;  %v89_v50 = vadd.f32 %v88_v38, %v87_v27  ;;  %v114_v52 = vadd.f32 %v113_v40, %v68_v30 }
  0x17   :  { %v82_v48 = vld [vmem:[#allocation3 + $0xe8] sm:$0xff]  ;;  %v83_v49 = vld [vmem:[#allocation3 + $0xf0] sm:$0xff]  ;;  %v106_v51 = vrot.slane %v105_v39, 4  ;;  %v131_v53 = vadd.f32 %v130_v41, %v75_v36  ;;  %v139_v56 = vadd.f32 %v78_v43, %v77_v37  ;;  %v324_v58 = vld [vmem:[#allocation6 + $0x18] sm:$0xff] }
  0x18   :  { %v98_v54 = vadd.f32 %v97_v45, %v96_v33  ;;  %v123_v55 = vadd.f32 %v122_v46, %v72_v35  ;;  %v148_v57 = vadd.f32 %v82_v48, %v81_v47  ;;  %v80_v59 = vld [vmem:[#allocation3 + $0xd8] sm:$0xff]  ;;  %v90_v61 = vrot.slane %v89_v50, 2  ;;  %v323_v13 = vld [vmem:[#allocation6 + $0x10] sm:$0xff]  ;;  %v322_v30 = vld [vmem:[#allocation6 + $0x8] sm:$0xff] }
  0x19   :  { %259 = vmatpush.bf16.msra.mxu0 %v325_v23  ;;  %v84_v60 = vld [vmem:[#allocation3 + $0xf8] sm:$0xff]  ;;  %v107_v62 = vadd.f32 %v106_v51, %v105_v39  ;;  %v115_v63 = vrot.slane %v114_v52, 4  ;;  %v132_v0 = vadd.f32 %v131_v53, %v76_v42  ;;  %v140_v3 = vadd.f32 %v139_v56, %v79_v44  ;;  %v321_v44 = vld [vmem:[#allocation6] sm:$0xff] }
  0x1a   :  { %v99_v1 = vrot.slane %v98_v54, 2  ;;  %v124_v2 = vrot.slane %v123_v55, 4  ;;  %v149_v4 = vadd.f32 %v148_v57, %v83_v49  ;;  %v91_v5 = vadd.f32 %v90_v61, %v89_v50  ;;  %v336_v57 = vld [vmem:[%s459_s2] ss:$0 sm:$0xff] }
  0x1b   :  { %v108_v6 = vrot.slane %v107_v62, 2  ;;  %v116_v7 = vadd.f32 %v115_v63, %v114_v52  ;;  %v133_v8 = vrot.slane %v132_v0, 4  ;;  %v141_v11 = vadd.f32 %v140_v3, %v80_v59 }
  0x1c   :  { %v100_v9 = vadd.f32 %v99_v1, %v98_v54  ;;  %v125_v10 = vadd.f32 %v124_v2, %v123_v55  ;;  %v150_v12 = vadd.f32 %v149_v4, %v84_v60  ;;  %v92_v14 = vrot.slane %v91_v5, 1 }
  0x1d   :  { %260 = vmatpush.bf16.msra.mxu0 %v324_v58  ;;  %v109_v15 = vadd.f32 %v108_v6, %v107_v62  ;;  %v117_v16 = vrot.slane %v116_v7, 2  ;;  %v134_v17 = vadd.f32 %v133_v8, %v132_v0  ;;  %v142_v20 = vrot.slane %v141_v11, 4 }
  0x1e   :  { %v101_v18 = vrot.slane %v100_v9, 1  ;;  %v126_v19 = vrot.slane %v125_v10, 2  ;;  %v151_v21 = vrot.slane %v150_v12, 4  ;;  %v93_v22 = vadd.f32 %v92_v14, %v91_v5 }
  0x1f   :  { %v110_v23 = vrot.slane %v109_v15, 1  ;;  %v118_v24 = vadd.f32 %v117_v16, %v116_v7  ;;  %v135_v25 = vrot.slane %v134_v17, 2  ;;  %v143_v28 = vadd.f32 %v142_v20, %v141_v11 }
  0x20   :  { %v102_v26 = vadd.f32 %v101_v18, %v100_v9  ;;  %v127_v27 = vadd.f32 %v126_v19, %v125_v10  ;;  %v152_v29 = vadd.f32 %v151_v21, %v150_v12 }
  0x21   :  { %261 = vmatpush.bf16.msra.mxu0 %v323_v13  ;;  %v111_v31 = vadd.f32 %v110_v23, %v109_v15  ;;  %v119_v32 = vrot.slane %v118_v24, 1  ;;  %v136_v33 = vadd.f32 %v135_v25, %v134_v17  ;;  %v144_v35 = vrot.slane %v143_v28, 2 }
  0x22   :  { %v128_v34 = vrot.slane %v127_v27, 1  ;;  %v153_v36 = vrot.slane %v152_v29, 2  ;;  %v166_v37 = vsel %vm165_vm0, %v102_v26, %v93_v22 }
  0x23   :  { %v120_v38 = vadd.f32 %v119_v32, %v118_v24  ;;  %v137_v39 = vrot.slane %v136_v33, 1  ;;  %v168_v40 = vsel %vm167_vm1, %v111_v31, %v166_v37  ;;  %v145_v42 = vadd.f32 %v144_v35, %v143_v28 }
  0x24   :  { %v129_v41 = vadd.f32 %v128_v34, %v127_v27  ;;  %v154_v43 = vadd.f32 %v153_v36, %v152_v29 }
  0x25   :  { %262 = vmatpush.bf16.msra.mxu0 %v322_v30  ;;  %v138_v45 = vadd.f32 %v137_v39, %v136_v33  ;;  %v170_v46 = vsel %vm169_vm2, %v120_v38, %v168_v40  ;;  %v146_v47 = vrot.slane %v145_v42, 1 }
  0x26   :  { %v155_v48 = vrot.slane %v154_v43, 1  ;;  %v172_v49 = vsel %vm171_vm3, %v129_v41, %v170_v46 }
  0x27   :  { %v174_v50 = vsel %vm173_vm4, %v138_v45, %v172_v49  ;;  %v147_v51 = vadd.f32 %v146_v47, %v145_v42 }
  0x28   :  { %v156_v52 = vadd.f32 %v155_v48, %v154_v43 }
  0x29   :  { %263 = vmatpush.bf16.msra.mxu0 %v321_v44  ;;  %v176_v53 = vsel %vm175_vm5, %v147_v51, %v174_v50 }
  0x2a   :  { %v178_v54 = vsel %vm177_vm6, %v156_v52, %v176_v53 }
  0x2b   :  { %v186_v55 = vmul.f32 0.03125, %v178_v54 }
  0x2d   :  { %v187_v56 = vpack.c.bf16 %v186_v55, %v186_v55 }
  0x2f   :  { %264 = vmatmul.bf16.vlgmr.msra.gmra.mxu0 %v187_v56 }
  0xac   :  { %v265_v58 = vpop.f32.mrf.mxu0 }
  0xad   :  { %v266_v59 = vadd.f32 %v336_v57, %v265_v58 }
  0xaf   :  { %v269_v60 = vmax.f32 %v266_v59, 0.0 }
  0xb1   :  { %270 = vst [vmem:[#allocation8] sm:$0xff] %v269_v60 }
  0xb2   :  { %281 = dma.vmem_to_hbm [thread:$0]  %s277_s27, 128, %s279_s30, [#allocation5]  }
  0xb4   :  { %v267_v61 = vpop.f32.mrf.mxu0 }
  0xb5   :  { %413 = dma.done.wait [#allocation5], 128  }
  0xb6   :  { %414 = vsyncadd [#allocation5], 4294967168 }
  0xb7   :  { %286 = vsyncpa [#allocation4], 1 }
  0xb8   :  { %287 = vsyncpa [#allocation7], 1 }
  0xb9   :  { %288 = vsyncpa [#allocation5], 1 }

</bundles_post_ra>
